<compile_context>
chip_gen: v5e
topology: v5e:2x2
jax: 0.10.0
libtpu: 0.0.40
codegen_flags: <defaults>
</compile_context>

<pallas_src>
import math
import functools

import jax
import jax.numpy as jnp
import numpy as np
from jax import lax
from jax.experimental import pallas as pl
from jax.experimental.pallas import tpu as pltpu

EPS = 1e-8


# ----------------------------------------------------------------------------
# Pallas kernel: TB (s,b) slices per grid step, fully fused forward.
# ----------------------------------------------------------------------------
def _enc_rws_mu_kernel(ob_ref, mask_ref, repl_ref,
                       w12a_ref, b12a_ref, w12b_ref, b12b_ref,   # fused trunk
                       w34a_ref, b34a_ref, w34b_ref, b34b_ref,   # fused heads (transposed)
                       out_ref, *, D, num_nss):
    ob = ob_ref[...]                                             # (TB*N, D)

    # Fused trunk: columns = [nss1 (Nss) | 1 | logits (K)].
    h12 = jnp.tanh(jnp.dot(ob, w12a_ref[...],
                           preferred_element_type=jnp.float32) + b12a_ref[...])
    f12 = jnp.dot(h12, w12b_ref[...],
                  preferred_element_type=jnp.float32) + b12b_ref[...]

    nss1_aug = f12[:, :num_nss + 1]                              # (TB*N, Nss+1)
    logits = f12[:, num_nss + 1:]                                # (TB*N, K)

    # Softmax over K (lanes).
    logits = logits - jnp.max(logits, axis=-1, keepdims=True)
    e = jnp.exp(logits)
    nss2 = e / jnp.sum(e, axis=-1, keepdims=True)                # (TB*N, K)

    # Block-diagonal softmax-weighted reduction over N for all TB slices:
    #   bw[r, b*K+k] = nss2[r, k]  iff  r // N == b, else 0.
    # The replication (nss2 @ P) is one tiny MXU matmul, the static mask is a
    # precomputed constant input (no per-step iota / int-div / select).
    bw = mask_ref[...] * jnp.dot(nss2, repl_ref[...],
                                 preferred_element_type=jnp.float32)  # (TB*N, TB*K)

    # Contract over the big (row) dim with the SMALL operand as lhs so only the
    # (TB*N, Nss+1) matrix is transposed internally.  The appended ones column
    # yields the per-(slice,k) denominator from the same matmul.
    red = jnp.einsum('rj,rc->jc', nss1_aug, bw,
                     preferred_element_type=jnp.float32)          # (Nss+1, TB*K)
    num = red[:num_nss, :]                                        # (Nss, TB*K)
    den = red[num_nss:num_nss + 1, :]                             # (1,   TB*K)
    nss_t = num / (den + EPS)                                     # normalize AFTER the matmul

    # Fused heads in transposed (feature-on-sublane) orientation; the constant
    # prior contribution is already folded into b34a.  Output tile (2D, TB*K)
    # is lane-dense (last dim = TB*K) -> unmasked stores.
    h34 = jnp.tanh(jnp.dot(w34a_ref[...], nss_t,
                           preferred_element_type=jnp.float32) + b34a_ref[...])  # (2H, TB*K)
    out = jnp.dot(w34b_ref[...], h34,
                  preferred_element_type=jnp.float32) + b34b_ref[...]            # (2D, TB*K)

    sub = lax.broadcasted_iota(jnp.int32, out.shape, 0)
    out_ref[...] = jnp.where(sub < D, out, jnp.exp(out))          # rows: [mu | sigma]


# ----------------------------------------------------------------------------
# Parameter packing (pure JAX, once per call)
# ----------------------------------------------------------------------------
def _pack_params(params, prior_mu, prior_sigma, K, D, H, num_nss):
    f32 = lambda a: a.astype(jnp.float32)
    w1a, b1a, w1b, b1b = map(f32, (params['w1a'], params['b1a'], params['w1b'], params['b1b']))
    w2a, b2a, w2b, b2b = map(f32, (params['w2a'], params['b2a'], params['w2b'], params['b2b']))
    w3a, b3a, w3b, b3b = map(f32, (params['w3a'], params['b3a'], params['w3b'], params['b3b']))
    w4a, b4a, w4b, b4b = map(f32, (params['w4a'], params['b4a'], params['w4b'], params['b4b']))

    prior_cat = jnp.concatenate([prior_mu.reshape(-1), prior_sigma.reshape(-1)]
                                ).reshape(1, 2 * D).astype(jnp.float32)

    # Fused trunk (nss1 | 1 | logits).  2H <= 128 keeps the fused contraction
    # inside one MXU tile; split back into two matmuls if H >= 128.
    w12a = jnp.concatenate([w1a, w2a], axis=1)                    # (D, 2H)
    b12a = jnp.concatenate([b1a, b2a], axis=1)                    # (1, 2H)
    zH1 = jnp.zeros((H, 1), jnp.float32)
    w12b = jnp.concatenate(
        [jnp.concatenate([w1b, zH1, jnp.zeros((H, K), jnp.float32)], axis=1),
         jnp.concatenate([jnp.zeros((H, num_nss), jnp.float32), zH1, w2b], axis=1)],
        axis=0)                                                   # (2H, Nss+1+K)
    b12b = jnp.concatenate([b1b, jnp.ones((1, 1), jnp.float32), b2b], axis=1)

    # Fused heads, transposed (feature-on-sublane); prior folded into biases.
    b3a_eff = b3a + prior_cat @ w3a[num_nss:]
    b4a_eff = b4a + prior_cat @ w4a[num_nss:]
    w34a_t = jnp.concatenate([w3a[:num_nss], w4a[:num_nss]], axis=1).T   # (2H, Nss)
    b34a_t = jnp.concatenate([b3a_eff, b4a_eff], axis=1).T               # (2H, 1)
    zDH = jnp.zeros((D, H), jnp.float32)
    w34b_t = jnp.concatenate(
        [jnp.concatenate([w3b.T, zDH], axis=1),
         jnp.concatenate([zDH, w4b.T], axis=1)], axis=0)                 # (2D, 2H)
    b34b_t = jnp.concatenate([b3b, b4b], axis=1).T                       # (2D, 1)

    return (w12a, b12a, w12b, b12b, w34a_t, b34a_t, w34b_t, b34b_t)


def _pick_tb(SB, N, target_rows=512, min_steps=2):
    """Batch enough (s,b) slices per step to amortize the ~0.35us/step
    pipeline overhead and fill MXU rows, while keeping >= 2 grid steps so
    v7x's two TensorCores both get work.  No alignment constraints needed:
    every blocked array is a (num_steps, ...) slab with full trailing dims."""
    tb = max(1, min(SB, max(1, target_rows // max(N, 1))))
    if SB >= min_steps:
        tb = min(tb, max(1, SB // min_steps))
    return tb


# ----------------------------------------------------------------------------
# Wrapper
# ----------------------------------------------------------------------------
def enc_rws_mu_forward(ob, params, prior_mu, prior_sigma, K, *,
                       sampled=True, mu_old=None, key=None, tb=None):
    """Returns (q_mu_mu, q_mu_sigma, mu) each of shape (S, B, K, D)."""
    S, B, N, D = ob.shape
    num_nss = params['w1b'].shape[1]
    H = params['w1a'].shape[1]
    SB = S * B

    packed = _pack_params(params, prior_mu, prior_sigma, K, D, H, num_nss)

    TB = tb if tb is not None else _pick_tb(SB, N)
    num_steps = -(-SB // TB)
    if num_steps > 1 and num_steps % 2:
        num_steps += 1                      # even split across v7x's two TCs
    SB_pad = num_steps * TB

    # (num_steps, TB*N, D) slabs: each grid step's block is a contiguous HBM
    # chunk and its trailing block dims equal the full array dims.
    ob2d = ob.reshape(SB * N, D).astype(jnp.float32)
    if SB_pad != SB:
        ob2d = jnp.pad(ob2d, ((0, (SB_pad - SB) * N), (0, 0)))
    ob3d = ob2d.reshape(num_steps, TB * N, D)

    # Static block-diagonal mask + lane-replication matrix, hoisted out of the
    # kernel (constant inputs, DMA'd once since their index map is constant).
    mask = (jnp.arange(TB * N)[:, None] // N ==
            jnp.arange(TB * K)[None, :] // K).astype(jnp.float32)     # (TB*N, TB*K)
    repl = (jnp.arange(TB * K)[None, :] % K ==
            jnp.arange(K)[:, None]).astype(jnp.float32)               # (K, TB*K)

    kernel = functools.partial(_enc_rws_mu_kernel, D=D, num_nss=num_nss)

    full_spec = lambda a: pl.BlockSpec(a.shape, lambda i: (0,) * a.ndim)
    in_specs = ([pl.BlockSpec((None, TB * N, D), lambda i: (i, 0, 0)),
                 full_spec(mask), full_spec(repl)]
                + [full_spec(a) for a in packed])
    out_specs = pl.BlockSpec((None, 2 * D, TB * K), lambda i: (i, 0, 0))

    out = pl.pallas_call(
        kernel,
        out_shape=jax.ShapeDtypeStruct((num_steps, 2 * D, TB * K), jnp.float32),
        grid=(num_steps,),
        in_specs=in_specs,
        out_specs=out_specs,
        compiler_params=pltpu.CompilerParams(
            dimension_semantics=("parallel",),
            vmem_limit_bytes=48 * 1024 * 1024),   # <= v7x 64 MiB physical VMEM
    )(ob3d, mask, repl, *packed)

    # (steps, 2D, TB*K) -> (SB*K, 2D) -> (S, B, K, 2D); mu | sigma on lanes.
    out = out.transpose(0, 2, 1).reshape(SB_pad * K, 2 * D)[:SB * K]
    out = out.reshape(S, B, K, 2 * D)
    q_mu_mu = out[..., :D]
    q_mu_sigma = out[..., D:]

    # TODO(synk): probtorch.Trace bookkeeping (log-prob registration) has no
    # Pallas equivalent; we return the distribution params and the sample.
    if sampled:
        noise = jax.random.normal(key, q_mu_mu.shape, jnp.float32)
        mu = q_mu_mu + q_mu_sigma * noise
    else:
        mu = mu_old
    return q_mu_mu, q_mu_sigma, mu


# ----------------------------------------------------------------------------
# Deterministic parameter init (PyTorch nn.Linear default: U(-1/sqrt(fan_in), .))
# ----------------------------------------------------------------------------
def init_params(key, K, D, H, num_nss):
    def linear(k, fan_in, fan_out):
        k1, k2 = jax.random.split(k)
        bound = 1.0 / math.sqrt(fan_in)
        w = jax.random.uniform(k1, (fan_in, fan_out), jnp.float32, -bound, bound)
        b = jax.random.uniform(k2, (1, fan_out), jnp.float32, -bound, bound)
        return w, b

    keys = jax.random.split(key, 8)
    p = {}
    p['w1a'], p['b1a'] = linear(keys[0], D, H)
    p['w1b'], p['b1b'] = linear(keys[1], H, num_nss)
    p['w2a'], p['b2a'] = linear(keys[2], D, H)
    p['w2b'], p['b2b'] = linear(keys[3], H, K)
    p['w3a'], p['b3a'] = linear(keys[4], num_nss + 2 * D, H)
    p['w3b'], p['b3b'] = linear(keys[5], H, D)
    p['w4a'], p['b4a'] = linear(keys[6], num_nss + 2 * D, H)
    p['w4b'], p['b4b'] = linear(keys[7], H, D)
    return p


# ----------------------------------------------------------------------------
# Pure-JAX reference (mirrors the PyTorch forward exactly)
# ----------------------------------------------------------------------------
def reference_forward(ob, p, prior_mu, prior_sigma, K):
    S, B, N, D = ob.shape
    lin = lambda x, w, b: jnp.matmul(x, w) + b
    nss1 = lin(jnp.tanh(lin(ob, p['w1a'], p['b1a'])), p['w1b'], p['b1b'])        # (S,B,N,Nss)
    nss2 = jax.nn.softmax(
        lin(jnp.tanh(lin(ob, p['w2a'], p['b2a'])), p['w2b'], p['b2b']), axis=-1)  # (S,B,N,K)
    num = jnp.einsum('sbnk,sbnj->sbkj', nss2, nss1)
    den = jnp.sum(nss2, axis=2)[..., None]
    nss = num / (den + EPS)                                                       # (S,B,K,Nss)
    pm = jnp.broadcast_to(prior_mu.reshape(1, 1, 1, D), (S, B, K, D))
    ps = jnp.broadcast_to(prior_sigma.reshape(1, 1, 1, D), (S, B, K, D))
    nss_prior = jnp.concatenate([nss, pm, ps], axis=-1)
    q_mu_mu = lin(jnp.tanh(lin(nss_prior, p['w3a'], p['b3a'])), p['w3b'], p['b3b'])
    q_mu_sigma = jnp.exp(
        lin(jnp.tanh(lin(nss_prior, p['w4a'], p['b4a'])), p['w4b'], p['b4b']))
    return q_mu_mu, q_mu_sigma


# ----------------------------------------------------------------------------
if __name__ == "__main__":
    # Small shapes: S samples, B batch, N points, D dims, K clusters.
    S, B, N, D = 2, 2, 8, 4
    K, H, NUM_NSS = 4, 32, 8

    root = jax.random.PRNGKey(0)
    k_param, k_ob, k_sample = jax.random.split(root, 3)

    params = init_params(k_param, K, D, H, NUM_NSS)
    ob = jax.random.normal(k_ob, (S, B, N, D), jnp.float32)
    prior_mu = jnp.zeros((D,), jnp.float32)
    prior_sigma = jnp.ones((D,), jnp.float32) * 2.0

    q_mu_mu, q_mu_sigma, mu = enc_rws_mu_forward(
        ob, params, prior_mu, prior_sigma, K, sampled=True, key=k_sample)
    jax.block_until_ready((q_mu_mu, q_mu_sigma, mu))

    # Numerical check against the pure-JAX reference of the PyTorch forward.
    ref_mu, ref_sigma = reference_forward(ob, params, prior_mu, prior_sigma, K)
    np.testing.assert_allclose(np.asarray(q_mu_mu), np.asarray(ref_mu),
                               rtol=5e-5, atol=5e-5)
    np.testing.assert_allclose(np.asarray(q_mu_sigma), np.asarray(ref_sigma),
                               rtol=5e-5, atol=5e-5)

    print("KERNEL_OK")
</pallas_src>

<mosaic_0001>
module attributes {stable_mosaic.version = 11 : i64} {
  func.func @_enc_rws_mu_kernel(%arg0: i32, %arg1: memref<1x16x4xf32, #tpu.memory_space<vmem>>, %arg2: memref<16x8xf32, #tpu.memory_space<vmem>>, %arg3: memref<4x8xf32, #tpu.memory_space<vmem>>, %arg4: memref<4x64xf32, #tpu.memory_space<vmem>>, %arg5: memref<1x64xf32, #tpu.memory_space<vmem>>, %arg6: memref<64x13xf32, #tpu.memory_space<vmem>>, %arg7: memref<1x13xf32, #tpu.memory_space<vmem>>, %arg8: memref<64x8xf32, #tpu.memory_space<vmem>>, %arg9: memref<64x1xf32, #tpu.memory_space<vmem>>, %arg10: memref<8x64xf32, #tpu.memory_space<vmem>>, %arg11: memref<8x1xf32, #tpu.memory_space<vmem>>, %arg12: memref<1x8x8xf32, #tpu.memory_space<vmem>>) attributes {dimension_semantics = [#tpu.dimension_semantics<parallel>], iteration_bounds = array<i64: 2>, scalar_prefetch = 0 : i64, scratch_operands = 0 : i64, tpu.core_type = #tpu.core_type<tc>, window_params = [{transform_indices = @transform_0, window_bounds = array<i64: 1, 16, 4>}, {pipeline_mode = #tpu.pipeline_mode<synchronous>, transform_indices = @transform_1, window_bounds = array<i64: 16, 8>}, {pipeline_mode = #tpu.pipeline_mode<synchronous>, transform_indices = @transform_2, window_bounds = array<i64: 4, 8>}, {pipeline_mode = #tpu.pipeline_mode<synchronous>, transform_indices = @transform_3, window_bounds = array<i64: 4, 64>}, {pipeline_mode = #tpu.pipeline_mode<synchronous>, transform_indices = @transform_4, window_bounds = array<i64: 1, 64>}, {pipeline_mode = #tpu.pipeline_mode<synchronous>, transform_indices = @transform_5, window_bounds = array<i64: 64, 13>}, {pipeline_mode = #tpu.pipeline_mode<synchronous>, transform_indices = @transform_6, window_bounds = array<i64: 1, 13>}, {pipeline_mode = #tpu.pipeline_mode<synchronous>, transform_indices = @transform_7, window_bounds = array<i64: 64, 8>}, {pipeline_mode = #tpu.pipeline_mode<synchronous>, transform_indices = @transform_8, window_bounds = array<i64: 64, 1>}, {pipeline_mode = #tpu.pipeline_mode<synchronous>, transform_indices = @transform_9, window_bounds = array<i64: 8, 64>}, {pipeline_mode = #tpu.pipeline_mode<synchronous>, transform_indices = @transform_10, window_bounds = array<i64: 8, 1>}, {transform_indices = @transform_11, window_bounds = array<i64: 1, 8, 8>}]} {
    %c0 = arith.constant 0 : index
    %c0_0 = arith.constant 0 : index
    %c0_1 = arith.constant 0 : index
    %0 = vector.load %arg1[%c0, %c0_0, %c0_1] : memref<1x16x4xf32, #tpu.memory_space<vmem>>, vector<1x16x4xf32>
    %1 = vector.shape_cast %0 : vector<1x16x4xf32> to vector<16x4xf32>
    %c0_2 = arith.constant 0 : index
    %c0_3 = arith.constant 0 : index
    %2 = vector.load %arg4[%c0_2, %c0_3] : memref<4x64xf32, #tpu.memory_space<vmem>>, vector<4x64xf32>
    %cst = arith.constant dense<0.000000e+00> : vector<16x64xf32>
    %3 = tpu.matmul %1, %2, %cst {dimension_numbers = #tpu.dot_dimension_numbers<[1], [0], [0], [1], [0, 0, 1, 1], [], []>} : vector<16x4xf32>, vector<4x64xf32>, vector<16x64xf32> -> vector<16x64xf32>
    %c0_4 = arith.constant 0 : index
    %c0_5 = arith.constant 0 : index
    %4 = vector.load %arg5[%c0_4, %c0_5] : memref<1x64xf32, #tpu.memory_space<vmem>>, vector<1x64xf32>
    %5 = vector.broadcast %4 : vector<1x64xf32> to vector<16x64xf32>
    %6 = arith.addf %3, %5 : vector<16x64xf32>
    %7 = math.tanh %6 : vector<16x64xf32>
    %c0_6 = arith.constant 0 : index
    %c0_7 = arith.constant 0 : index
    %8 = vector.load %arg6[%c0_6, %c0_7] : memref<64x13xf32, #tpu.memory_space<vmem>>, vector<64x13xf32>
    %cst_8 = arith.constant dense<0.000000e+00> : vector<16x13xf32>
    %9 = tpu.matmul %7, %8, %cst_8 {dimension_numbers = #tpu.dot_dimension_numbers<[1], [0], [0], [1], [0, 0, 1, 1], [], []>} : vector<16x64xf32>, vector<64x13xf32>, vector<16x13xf32> -> vector<16x13xf32>
    %c0_9 = arith.constant 0 : index
    %c0_10 = arith.constant 0 : index
    %10 = vector.load %arg7[%c0_9, %c0_10] : memref<1x13xf32, #tpu.memory_space<vmem>>, vector<1x13xf32>
    %11 = vector.broadcast %10 : vector<1x13xf32> to vector<16x13xf32>
    %12 = arith.addf %9, %11 : vector<16x13xf32>
    %13 = vector.extract_strided_slice %12 {offsets = [0, 0], sizes = [16, 9], strides = [1, 1]} : vector<16x13xf32> to vector<16x9xf32>
    %14 = vector.extract_strided_slice %12 {offsets = [0, 9], sizes = [16, 4], strides = [1, 1]} : vector<16x13xf32> to vector<16x4xf32>
    %cst_11 = arith.constant dense<0xFF800000> : vector<16xf32>
    %15 = vector.multi_reduction <maximumf>, %14, %cst_11 [1] : vector<16x4xf32> to vector<16xf32>
    %16 = vector.shape_cast %15 : vector<16xf32> to vector<16x1xf32>
    %17 = vector.broadcast %16 : vector<16x1xf32> to vector<16x4xf32>
    %18 = arith.subf %14, %17 : vector<16x4xf32>
    %19 = math.exp %18 : vector<16x4xf32>
    %cst_12 = arith.constant dense<0.000000e+00> : vector<16xf32>
    %20 = vector.multi_reduction <add>, %19, %cst_12 [1] : vector<16x4xf32> to vector<16xf32>
    %21 = vector.shape_cast %20 : vector<16xf32> to vector<16x1xf32>
    %22 = vector.broadcast %21 : vector<16x1xf32> to vector<16x4xf32>
    %23 = arith.divf %19, %22 : vector<16x4xf32>
    %c0_13 = arith.constant 0 : index
    %c0_14 = arith.constant 0 : index
    %24 = vector.load %arg2[%c0_13, %c0_14] : memref<16x8xf32, #tpu.memory_space<vmem>>, vector<16x8xf32>
    %c0_15 = arith.constant 0 : index
    %c0_16 = arith.constant 0 : index
    %25 = vector.load %arg3[%c0_15, %c0_16] : memref<4x8xf32, #tpu.memory_space<vmem>>, vector<4x8xf32>
    %cst_17 = arith.constant dense<0.000000e+00> : vector<16x8xf32>
    %26 = tpu.matmul %23, %25, %cst_17 {dimension_numbers = #tpu.dot_dimension_numbers<[1], [0], [0], [1], [0, 0, 1, 1], [], []>} : vector<16x4xf32>, vector<4x8xf32>, vector<16x8xf32> -> vector<16x8xf32>
    %27 = arith.mulf %24, %26 : vector<16x8xf32>
    "tpu.trace_start"() <{level = 10 : i32, message = "rj,rc->jc"}> : () -> ()
    %cst_18 = arith.constant dense<0.000000e+00> : vector<9x8xf32>
    %28 = tpu.matmul %13, %27, %cst_18 {dimension_numbers = #tpu.dot_dimension_numbers<[0], [0], [1], [1], [0, 1, 1, 1], [], []>} : vector<16x9xf32>, vector<16x8xf32>, vector<9x8xf32> -> vector<9x8xf32>
    "tpu.trace_stop"() : () -> ()
    %29 = vector.extract_strided_slice %28 {offsets = [0, 0], sizes = [8, 8], strides = [1, 1]} : vector<9x8xf32> to vector<8x8xf32>
    %30 = vector.extract_strided_slice %28 {offsets = [8, 0], sizes = [1, 8], strides = [1, 1]} : vector<9x8xf32> to vector<1x8xf32>
    %cst_19 = arith.constant 9.99999993E-9 : f32
    %31 = vector.broadcast %cst_19 : f32 to vector<1x8xf32>
    %32 = arith.addf %30, %31 : vector<1x8xf32>
    %33 = vector.broadcast %32 : vector<1x8xf32> to vector<8x8xf32>
    %34 = arith.divf %29, %33 : vector<8x8xf32>
    %c0_20 = arith.constant 0 : index
    %c0_21 = arith.constant 0 : index
    %35 = vector.load %arg8[%c0_20, %c0_21] : memref<64x8xf32, #tpu.memory_space<vmem>>, vector<64x8xf32>
    %cst_22 = arith.constant dense<0.000000e+00> : vector<64x8xf32>
    %36 = tpu.matmul %35, %34, %cst_22 {dimension_numbers = #tpu.dot_dimension_numbers<[1], [0], [0], [1], [0, 0, 1, 1], [], []>} : vector<64x8xf32>, vector<8x8xf32>, vector<64x8xf32> -> vector<64x8xf32>
    %c0_23 = arith.constant 0 : index
    %c0_24 = arith.constant 0 : index
    %37 = vector.load %arg9[%c0_23, %c0_24] : memref<64x1xf32, #tpu.memory_space<vmem>>, vector<64x1xf32>
    %38 = vector.broadcast %37 : vector<64x1xf32> to vector<64x8xf32>
    %39 = arith.addf %36, %38 : vector<64x8xf32>
    %40 = math.tanh %39 : vector<64x8xf32>
    %c0_25 = arith.constant 0 : index
    %c0_26 = arith.constant 0 : index
    %41 = vector.load %arg10[%c0_25, %c0_26] : memref<8x64xf32, #tpu.memory_space<vmem>>, vector<8x64xf32>
    %cst_27 = arith.constant dense<0.000000e+00> : vector<8x8xf32>
    %42 = tpu.matmul %41, %40, %cst_27 {dimension_numbers = #tpu.dot_dimension_numbers<[1], [0], [0], [1], [0, 0, 1, 1], [], []>} : vector<8x64xf32>, vector<64x8xf32>, vector<8x8xf32> -> vector<8x8xf32>
    %c0_28 = arith.constant 0 : index
    %c0_29 = arith.constant 0 : index
    %43 = vector.load %arg11[%c0_28, %c0_29] : memref<8x1xf32, #tpu.memory_space<vmem>>, vector<8x1xf32>
    %44 = vector.broadcast %43 : vector<8x1xf32> to vector<8x8xf32>
    %45 = arith.addf %42, %44 : vector<8x8xf32>
    %46 = tpu.iota {dimensions = array<i32: 0>} : vector<8x8xi32>
    %c4_i32 = arith.constant 4 : i32
    %47 = vector.broadcast %c4_i32 : i32 to vector<8x8xi32>
    %48 = arith.cmpi slt, %46, %47 : vector<8x8xi32>
    %49 = math.exp %45 : vector<8x8xf32>
    %50 = arith.select %48, %45, %49 : vector<8x8xi1>, vector<8x8xf32>
    %c0_30 = arith.constant 0 : index
    %c0_31 = arith.constant 0 : index
    %c0_32 = arith.constant 0 : index
    %51 = vector.load %arg12[%c0_30, %c0_31, %c0_32] : memref<1x8x8xf32, #tpu.memory_space<vmem>>, vector<1x8x8xf32>
    %52 = vector.shape_cast %51 : vector<1x8x8xf32> to vector<8x8xf32>
    %53 = vector.shape_cast %50 : vector<8x8xf32> to vector<1x8x8xf32>
    tpu.vector_store %arg12[%c0_30, %c0_31, %c0_32], %53 {strides = array<i32>} : memref<1x8x8xf32, #tpu.memory_space<vmem>>, vector<1x8x8xf32>,
    return
  }
  func.func @transform_0(%arg0: i32) -> (i32, i32, i32) {
    %c0_i32 = arith.constant 0 : i32
    %c0_i32_0 = arith.constant 0 : i32
    %c0_i32_1 = arith.constant 0 : i32
    return %arg0, %c0_i32, %c0_i32_0 : i32, i32, i32
  }
  func.func @transform_1(%arg0: i32) -> (i32, i32) {
    %c0_i32 = arith.constant 0 : i32
    %c0_i32_0 = arith.constant 0 : i32
    %c0_i32_1 = arith.constant 0 : i32
    return %c0_i32, %c0_i32_0 : i32, i32
  }
  func.func @transform_2(%arg0: i32) -> (i32, i32) {
    %c0_i32 = arith.constant 0 : i32
    %c0_i32_0 = arith.constant 0 : i32
    %c0_i32_1 = arith.constant 0 : i32
    return %c0_i32, %c0_i32_0 : i32, i32
  }
  func.func @transform_3(%arg0: i32) -> (i32, i32) {
    %c0_i32 = arith.constant 0 : i32
    %c0_i32_0 = arith.constant 0 : i32
    %c0_i32_1 = arith.constant 0 : i32
    return %c0_i32, %c0_i32_0 : i32, i32
  }
  func.func @transform_4(%arg0: i32) -> (i32, i32) {
    %c0_i32 = arith.constant 0 : i32
    %c0_i32_0 = arith.constant 0 : i32
    %c0_i32_1 = arith.constant 0 : i32
    return %c0_i32, %c0_i32_0 : i32, i32
  }
  func.func @transform_5(%arg0: i32) -> (i32, i32) {
    %c0_i32 = arith.constant 0 : i32
    %c0_i32_0 = arith.constant 0 : i32
    %c0_i32_1 = arith.constant 0 : i32
    return %c0_i32, %c0_i32_0 : i32, i32
  }
  func.func @transform_6(%arg0: i32) -> (i32, i32) {
    %c0_i32 = arith.constant 0 : i32
    %c0_i32_0 = arith.constant 0 : i32
    %c0_i32_1 = arith.constant 0 : i32
    return %c0_i32, %c0_i32_0 : i32, i32
  }
  func.func @transform_7(%arg0: i32) -> (i32, i32) {
    %c0_i32 = arith.constant 0 : i32
    %c0_i32_0 = arith.constant 0 : i32
    %c0_i32_1 = arith.constant 0 : i32
    return %c0_i32, %c0_i32_0 : i32, i32
  }
  func.func @transform_8(%arg0: i32) -> (i32, i32) {
    %c0_i32 = arith.constant 0 : i32
    %c0_i32_0 = arith.constant 0 : i32
    %c0_i32_1 = arith.constant 0 : i32
    return %c0_i32, %c0_i32_0 : i32, i32
  }
  func.func @transform_9(%arg0: i32) -> (i32, i32) {
    %c0_i32 = arith.constant 0 : i32
    %c0_i32_0 = arith.constant 0 : i32
    %c0_i32_1 = arith.constant 0 : i32
    return %c0_i32, %c0_i32_0 : i32, i32
  }
  func.func @transform_10(%arg0: i32) -> (i32, i32) {
    %c0_i32 = arith.constant 0 : i32
    %c0_i32_0 = arith.constant 0 : i32
    %c0_i32_1 = arith.constant 0 : i32
    return %c0_i32, %c0_i32_0 : i32, i32
  }
  func.func @transform_11(%arg0: i32) -> (i32, i32, i32) {
    %c0_i32 = arith.constant 0 : i32
    %c0_i32_0 = arith.constant 0 : i32
    %c0_i32_1 = arith.constant 0 : i32
    return %arg0, %c0_i32, %c0_i32_0 : i32, i32, i32
  }
}

</mosaic_0001>

<bundles_post_ra>
// kernel: tpu_custom_call.1
= control target key start
LH: loop header
LB: loop body
LE: loop exit
PB: predicated region body
PF: predicated region fallthrough
CT: control target
= control target key end

     0   :  { %s1332_s0 = inlined_call_operand.vmem [shape: f32[2,16,4], index: 0, kind: input, shape index: {}]   ;;  %s1333_s1 = inlined_call_operand.vmem [shape: f32[16,8], index: 1, kind: input, shape index: {}]   ;;  %s1334_s2 = inlined_call_operand.vmem [shape: f32[4,8], index: 2, kind: input, shape index: {}]   ;;  %s1335_s3 = inlined_call_operand.vmem [shape: f32[4,64], index: 3, kind: input, shape index: {}]   ;;  %s1336_s4 = inlined_call_operand.vmem [shape: f32[1,64], index: 4, kind: input, shape index: {}]   ;;  %s1337_s5 = inlined_call_operand.vmem [shape: f32[64,13], index: 5, kind: input, shape index: {}]   ;;  %s1338_s6 = inlined_call_operand.vmem [shape: f32[1,13], index: 6, kind: input, shape index: {}]   ;;  %s1339_s7 = inlined_call_operand.vmem [shape: f32[64,8], index: 7, kind: input, shape index: {}]   ;;  %s1340_s8 = inlined_call_operand.vmem [shape: f32[64,1], index: 8, kind: input, shape index: {}]   ;;  %s1341_s9 = inlined_call_operand.vmem [shape: f32[8,64], index: 9, kind: input, shape index: {}]   ;;  %s1342_s10 = inlined_call_operand.vmem [shape: f32[8,1], index: 10, kind: input, shape index: {}]   ;;  %s1343_s11 = inlined_call_operand.hbm [shape: f32[2,8,8], index: 11, kind: output, shape index: {}]  }
   0x1   :  { %1344 = sst [smem:[#allocation5_spill]] %s1332_s0 }
   0x2   :  { %16 = vsyncpa [#allocation3], 0 }
   0x3   :  { %18 = vsyncpa [#allocation3 + $0x1], 0  ;;  %s1126_s17 = smov 0   ;;  %s1128_s18 = smov 0  }
   0x4   :  { %s1130_s19 = smov 0   ;;  %s1132_s20 = smov 0  }
   0x5 LB: > { %s1147_s21 = sadd.s32 4294967295, %s1062_s20   ;;  %s889_s22 = sadd.s32 4294967294, %s1062_s20   ;;  %s1062_s20 = sphi %s1132_s20, %s1351_s20   ;;  %s1058_s19 = sphi %s1130_s19, %s1350_s19   ;;  %s1054_s18 = sphi %s1128_s18, %s1349_s18   ;;  %s1050_s17 = sphi %s1126_s17, %s1348_s17  }
   0x6   : > { %s1151_s23 = sadd.s32 1, %s1062_s20   ;;  %s267_s24 = sadd.s32 1, %s1058_s19 }
   0x7   : > { %s264_s25 = ssub.s32 %s1062_s20, %s1151_s23  ;;  %p277_p0 = scmp.ne.s32.totalorder %s1058_s19, %s1054_s18 }
   0x8   : > { %p265_p1 = scmp.eq.s32.totalorder %s264_s25, 0  ;;  %p278_p2 = scmp.eq.s32.totalorder %s1147_s21, 1 }
   0x9   : > { %p283_p3 = scmp.ne.s32.totalorder %s1054_s18, %s1050_s17  ;;  %p284_p4 = scmp.eq.s32.totalorder %s889_s22, 1 }
   0xa   : > { %s1162_s26 = scalar_select %p265_p1, %s1058_s19, %s267_s24  }
   0xb   : > { %p1164_p5 = por %p278_p2, %p277_p0  ;;  %p1168_p6 = por %p284_p4, %p283_p3 }
   0xc   : > { %p892_p7 = scmp.ge.s32.totalorder %s1062_s20, 1  ;;  %p340_p8 = scmp.lt.s32.totalorder %s1062_s20, 3 }
   0xe   : > { %p341_p9 = pnand %p892_p7, %p340_p8 }
   0xf   : > { %p380_p10 = scmp.lt.s32.totalorder (!%p341_p9), %s1147_s21, 1  ;;  %s1347_s0 = sld [smem:[#allocation5_spill]] (!%p341_p9) }
  0x10   : > { %344 = sbr.rel (%p341_p9) target bundleno = 1428 (0x594), region = 64  ;;  %s1064_s22 = smov (!%p341_p9), 119  }
  0x11   : > { %s377_s29 = sand.u32 (!%p341_p9), 1, %s1054_s18  }
  0x12   : > { %s893_s30 = sshll.u32 (!%p341_p9), %s377_s29, 3 }
  0x15   : > { %v387_v0 = vld [vmem:[%s1335_s3] sm:$0xf]  ;;  %vm399_vm0 = vcmask 1043456   ;;  %v435_v1 = vld [vmem:[%s1337_s5 + $0x38] sm:$0xff]  ;;  %v434_v2 = vld [vmem:[%s1337_s5 + $0x30] sm:$0xff]  ;;  %s381_s16 = scalar_select %p380_p10, %s1147_s21, 1 }
  0x16   : > { %896 = vmatpush.msk.msra.mxu1 %vm399_vm0, %v387_v0  ;;  %v433_v3 = vld [vmem:[%s1337_s5 + $0x28] sm:$0xff]  ;;  %vm392_vm1 = vcmask 31744   ;;  %v432_v6 = vld [vmem:[%s1337_s5 + $0x20] sm:$0xff]  ;;  %v431_v7 = vld [vmem:[%s1337_s5 + $0x18] sm:$0xff]  ;;  %vm440_vm2 = vcmask 523264   ;;  %vm470_vm3 = vcmask 105544  }
  0x17   : > { %s919_s25 = sshll.u32 %s381_s16, 4  ;;  %v430_v8 = vld [vmem:[%s1337_s5 + $0x10] sm:$0xff]  ;;  %v429_v9 = vld [vmem:[%s1337_s5 + $0x8] sm:$0xff]  ;;  %v428_v10 = vld [vmem:[%s1337_s5] sm:$0xff]  ;;  %vm600_vm12 = vcmask 130048   ;;  %s379_s16 = scalar_lea.vmem [#allocation2], %s893_s30 }
  0x18   : > { %455 = vmatpush.msrb.mxu1 %v435_v1  ;;  %s384_s12 = scalar_lea.vmem %s1347_s0, %s919_s25  ;;  %v966_v11 = vld [vmem:[%s1336_s4] ss:$0 sm:$0xff]  ;;  %v528_v0 = vld [vmem:[%s1333_s1 + $0x8] sm:$0xff]  ;;  %s815_s25 = scalar_lea.sflag [#allocation3], %s377_s29 }
  0x19   : > { %v385_v4 = vld [vmem:[%s384_s12] sm:$0xff]  ;;  %v386_v5 = vld [vmem:[%s384_s12 + $0x8] sm:$0xff]  ;;  %s916_s12 = sshll.u32 %s1147_s21, 3  ;;  %s1020_s30 = scalar_lea.hbm %s1343_s11, 16 }
  0x1a   : > { %456 = vmatpush.msrb.mxu1 %v434_v2  ;;  %v967_v19 = vld [vmem:[%s1338_s6] ss:$0 sm:$0xff]  ;;  %s825_s15 = scalar_lea.hbm %s1343_s11, %s916_s12 }
  0x1b   : > { %897 = vmatmul.msk.f32.vlgmr.msra.gmra.mxu1 %vm392_vm1, %v385_v4  ;;  %v529_v37 = vld [vmem:[%s1334_s2] sm:$0xf]  ;;  %s829_s24 = sshll.u32 %s825_s15, 4  ;;  %s830_s24 = int_to_ptr.hbm [resolvable:$true] %s829_s24 }
  0x1c   : > { %457 = vmatpush.msrb.mxu1 %v433_v3  ;;  %920 = vmatpush.msk.msra.mxu2 %vm399_vm0, %v529_v37  ;;  %v527_v2 = vld [vmem:[%s1333_s1] sm:$0xff]  ;;  %s1014_s21 = sshra.s32 %s830_s24, 4  ;;  %s1015_s21 = int_to_ptr.hbm [resolvable:$true] %s1014_s21 }
  0x1d   : > { %901 = vmatpush.msk.msra.mxu0 %vm399_vm0, %v529_v37  ;;  %v652_v37 = vld [vmem:[%s1339_s7 + $0x28] sm:$0xff]  ;;  %s1016_s0 = scalar_lea.hbm %s1015_s21, 8  ;;  %p1021_p0 = scmp.lt.s32.totalorder %s1015_s21, %s1343_s11 }
  0x1e   : > { %458 = vmatpush.msrb.mxu1 %v432_v6  ;;  %p1017_p11 = scmp.ne.s32.totalorder %s1015_s21, %s1016_s0  ;;  %p1022_p1 = scmp.lt.s32.totalorder %s1020_s30, %s1016_s0 }
  0x20   : > { %459 = vmatpush.msrb.mxu1 %v431_v7  ;;  %p1018_p12 = pnand %p1017_p11, %p1164_p5  ;;  %p1023_p2 = por %p1022_p1, %p1021_p0 }
  0x22   : > { %460 = vmatpush.msrb.mxu1 %v430_v8  ;;  %v662_v8 = vld [vmem:[%s1340_s8 + $0x38] sm:$0xff]  ;;  %p1019_p13 = pneg %p1018_p12 }
  0x23   : > { %898 = vmatmul.msk.f32.gmra.mxu1 %vm392_vm1, %v386_v5 }
  0x24   : > { %461 = vmatpush.msrb.mxu1 %v429_v9  ;;  %v1065_v9 = vmov 0   ;;  %p1024_p3 = pnand %p1023_p2, %p1019_p13 }
  0x25   : > { %964 = vset.pattern.permute.xlu1 %v1065_v9  ;;  %965 = vset.pattern.permute.xlu0 %v1065_v9 }
  0x26   : > { %462 = vmatpush.msrb.mxu1 %v428_v10  ;;  %v661_v10 = vld [vmem:[%s1340_s8 + $0x30] sm:$0xff] }
  0x98   : > { %v420_v12 = vpop.f32.mrf.mxu1 }
  0x99   : > { %v421_v13 = vadd.f32 %v966_v11, %v420_v12  ;;  %v659_v12 = vld [vmem:[%s1340_s8 + $0x20] sm:$0xff] }
  0x9b   : > { %968 = vtanh.f32 %v421_v13 }
  0xa0   : > { %v423_v14 = vpop.f32.mrf.mxu1 }
  0xa1   : > { %v969_v15 = vpop.eup %968  ;;  %v424_v16 = vadd.f32 %v966_v11, %v423_v14 }
  0xa2   : > { %899 = vmatmul.msk.f32.vlgmr.msrb.gmra.mxu1 %vm440_vm2, %v969_v15 }
  0xa3   : > { %970 = vtanh.f32 %v424_v16  ;;  %v658_v16 = vld [vmem:[%s1340_s8 + $0x18] sm:$0xff] }
  0xa9   : > { %v971_v17 = vpop.eup %970 }
  0xaa   : > { %900 = vmatmul.msk.f32.gmra.mxu1 %vm440_vm2, %v971_v17 }
 0x11f   : > { %v464_v18 = vpop.f32.mrf.mxu1 }
 0x120   : > { %v465_v23 = vadd.f32 %v967_v19, %v464_v18 }
 0x122   : > { %v471_v24 = vsel %vm470_vm3, %v465_v23, -inf }
 0x127   : > { %v467_v20 = vpop.f32.mrf.mxu1 }
 0x128   : > { %v468_v21 = vadd.f32 %v967_v19, %v467_v20  ;;  %v656_v19 = vld [vmem:[%s1340_s8 + $0x8] sm:$0xff] }
 0x12a   : > { %v474_v22 = vsel %vm470_vm3, %v468_v21, -inf }
 0x12b   : > { %475 = vmax.xlane.f32.xlu0 %v474_v22 }
 0x133   : > { %472 = vmax.xlane.f32.xlu0 %v471_v24  ;;  %v660_v24 = vld [vmem:[%s1340_s8 + $0x28] sm:$0xff] }
 0x19e   : > { %v476_v25 = vpop.xlane.xlu0 %475 }
 0x19f   : > { %v478_v26 = vsub.f32 %v468_v21, %v476_v25 }
 0x1a1   : > { %v481_v27 = vmul.f32 1.442695, %v478_v26 }
 0x1a3   : > { %972 = vpow2.f32 %v481_v27 }
 0x1a6   : > { %v473_v28 = vpop.xlane.xlu0 %472 }
 0x1a7   : > { %v477_v29 = vsub.f32 %v465_v23, %v473_v28 }
 0x1a9   : > { %v973_v30 = vpop.eup %972  ;;  %v479_v31 = vmul.f32 1.442695, %v477_v29  ;;  %v778_v29 = vld [vmem:[%s1342_s10] sm:$0xff] }
 0x1aa   : > { %487 = vrot.lane.b32.xlu1 %v973_v30, %s1064_s22 }
 0x1ab   : > { %974 = vpow2.f32 %v479_v31  ;;  %v650_v31 = vld [vmem:[%s1339_s7 + $0x18] sm:$0xff] }
 0x1b1   : > { %v975_v32 = vpop.eup %974 }
 0x1b2   : > { %485 = vrot.lane.b32.xlu1 %v975_v32, %s1064_s22 }
 0x21c   : > { %v488_v33 = vpop.permute.xlu1 %487 }
 0x21d   : > { %v494_v34 = vsel %vm392_vm1, %v488_v33, 0.0  ;;  %v657_v33 = vld [vmem:[%s1340_s8 + $0x10] sm:$0xff] }
 0x21e   : > { %495 = vadd.xlane.f32.xlu2 %v494_v34  ;;  %v651_v34 = vld [vmem:[%s1339_s7 + $0x20] sm:$0xff] }
 0x224   : > { %v486_v35 = vpop.permute.xlu1 %485 }
 0x225   : > { %v491_v36 = vsel %vm392_vm1, %v486_v35, 0.0  ;;  %v648_v35 = vld [vmem:[%s1339_s7 + $0x8] sm:$0xff] }
 0x226   : > { %492 = vadd.xlane.f32.xlu2 %v491_v36  ;;  %v655_v36 = vld [vmem:[%s1340_s8] sm:$0xff] }
 0x24f   : > { %568 = vxpose.xlu2.b32.start [1/2] (short) (narrow) %v465_v23, 16 }
 0x257   : > { %569 = vxpose.xlu2.b32.end [2/2] (short) (narrow) %v468_v21, 16 }
 0x291   : > { %v496_v38 = vpop.xlane.xlu2 %495 }
 0x292   : > { %976 = vrcp.f32 %v496_v38  ;;  %v523_v43 = vand.u32 2147483648, %v496_v38  ;;  %v521_v45 = vand.u32 2147483647, %v496_v38  ;;  %vm517_vm5 = vweird.f32 %v496_v38 }
 0x294   : > { %v524_v48 = vor.u32 1.1754944e-38, %v523_v43  ;;  %vm522_vm7 = vcmp.eq.f32.partialorder %v521_v45, 8.507059e+37 }
 0x298   : > { %v977_v39 = vpop.eup %976 }
 0x299   : > { %v513_v40 = vmul.f32 %v977_v39, %v496_v38  ;;  %v493_v41 = vpop.xlane.xlu2 %492  ;;  %vm518_vm4 = vweird.f32 %v977_v39  ;;  %v649_v38 = vld [vmem:[%s1339_s7 + $0x10] sm:$0xff] }
 0x29a   : > { %978 = vrcp.f32 %v493_v41  ;;  %vm519_vm6 = vmor %vm517_vm5, %vm518_vm4  ;;  %v508_v54 = vand.u32 2147483648, %v493_v41  ;;  %v506_v56 = vand.u32 2147483647, %v493_v41  ;;  %vm502_vm9 = vweird.f32 %v493_v41 }
 0x29b   : > { %v514_v42 = vsub.f32 1.0, %v513_v40  ;;  %v654_v40 = vld [vmem:[%s1339_s7 + $0x38] sm:$0xff] }
 0x29c   : > { %v509_v58 = vor.u32 1.1754944e-38, %v508_v54  ;;  %vm507_vm11 = vcmp.eq.f32.partialorder %v506_v56, 8.507059e+37 }
 0x29d   : > { %v515_v44 = vmul.f32 %v977_v39, %v514_v42 }
 0x29f   : > { %v516_v46 = vadd.f32 %v977_v39, %v515_v44 }
 0x2a0   : > { %v979_v47 = vpop.eup %978 }
 0x2a1   : > { %v498_v49 = vmul.f32 %v979_v47, %v493_v41  ;;  %v520_v50 = vsel %vm519_vm6, %v977_v39, %v516_v46  ;;  %vm503_vm8 = vweird.f32 %v979_v47  ;;  %v653_v39 = vld [vmem:[%s1339_s7 + $0x30] sm:$0xff] }
 0x2a2   : > { %v525_v51 = vsel %vm522_vm7, %v524_v48, %v520_v50  ;;  %vm504_vm10 = vmor %vm502_vm9, %vm503_vm8 }
 0x2a3   : > { %v499_v52 = vsub.f32 1.0, %v498_v49  ;;  %v526_v53 = vmul.f32 %v973_v30, %v525_v51 }
 0x2a5   : > { %v500_v55 = vmul.f32 %v979_v47, %v499_v52  ;;  %534 = vrot.lane.b32.xlu0 %v526_v53, %s1064_s22 }
 0x2a7   : > { %v501_v57 = vadd.f32 %v979_v47, %v500_v55 }
 0x2a9   : > { %v505_v59 = vsel %vm504_vm10, %v979_v47, %v501_v57 }
 0x2aa   : > { %v510_v60 = vsel %vm507_vm11, %v509_v58, %v505_v59 }
 0x2ab   : > { %v511_v61 = vmul.f32 %v975_v32, %v510_v60  ;;  %v647_v32 = vld [vmem:[%s1339_s7] sm:$0xff] }
 0x2ad   : > { %532 = vrot.lane.b32.xlu1 %v511_v61, %s1064_s22  ;;  %690 = vperm.xlu0 %965, %v660_v24   ;;  %s827_s22 = sshll.u32 %s379_s16, 4  ;;  %s828_s22 = int_to_ptr.vmem [resolvable:$true] %s827_s22 }
 0x2b5   : > { %700 = vperm.xlu1 %964, %v662_v8   ;;  %675 = vperm.xlu0 %965, %v657_v33   ;;  %v777_v8 = vld [vmem:[%s1341_s9] sm:$0xff] }
 0x2bd   : > { %695 = vperm.xlu1 %964, %v661_v10   ;;  %665 = vperm.xlu0 %965, %v655_v36  }
 0x2c5   : > { %685 = vperm.xlu1 %964, %v659_v12  }
 0x2cd   : > { %680 = vperm.xlu1 %964, %v658_v16  }
 0x2d5   : > { %670 = vperm.xlu1 %964, %v656_v19  }
 0x2dd   : > { %781 = vperm.xlu1 %964, %v778_v29  }
 0x2e8   : > { %v584_v4 = vpop.trf.xlu2 }
 0x2f0   : > { %v585_v7 = vpop.trf.xlu2 }
 0x317   : > { %v535_v62 = vpop.permute.xlu0 %534 }
 0x318   : > { %903 = vmatmul.msk.f32.vlgmr.msra.gmra.mxu2 %vm392_vm1, %v535_v62 }
 0x31f   : > { %v533_v63 = vpop.permute.xlu1 %532  ;;  %v691_v48 = vpop.permute.xlu0 %690 }
 0x320   : > { %902 = vmatmul.msk.f32.vlgmr.msra.gmra.mxu0 %vm392_vm1, %v533_v63  ;;  %vm703_vm1 = vcmask 64512  }
 0x327   : > { %v701_v42 = vpop.permute.xlu1 %700  ;;  %v676_v52 = vpop.permute.xlu0 %675 }
 0x32f   : > { %v696_v44 = vpop.permute.xlu1 %695  ;;  %v666_v63 = vpop.permute.xlu0 %665 }
 0x337   : > { %v686_v47 = vpop.permute.xlu1 %685 }
 0x33f   : > { %v681_v51 = vpop.permute.xlu1 %680 }
 0x347   : > { %v671_v62 = vpop.permute.xlu1 %670 }
 0x34f   : > { %v782_v10 = vpop.permute.xlu1 %781 }
 0x39b   : > { %v563_v1 = vpop.f32.mrf.mxu2 }
 0x39c   : > { %v567_v3 = vmul.f32 %v563_v1, %v528_v0 }
 0x39d   : > { %v560_v5 = vpop.f32.mrf.mxu0 }
 0x39e   : > { %v566_v6 = vmul.f32 %v560_v5, %v527_v2  ;;  %621 = vmatpush.msrb.mxu2 %v567_v3 }
 0x3a0   : > { %622 = vmatpush.msrb.mxu2 %v566_v6 }
 0x3a1   : > { %904 = vmatmul.msk.f32.vlgmr.msrb.gmra.mxu2 %vm600_vm12, %v584_v4 }
 0x3a9   : > { %905 = vmatmul.msk.f32.gmra.mxu2 %vm600_vm12, %v585_v7 }
 0x424   : > { %v624_v11 = vpop.f32.mrf.mxu2 }
 0x42c   : > { %v627_v13 = vpop.f32.mrf.mxu2 }
 0x42d   : > { %v630_v14 = vadd.f32 1e-08, %v627_v13  ;;  %v807_v13 = vlaneseq }
 0x42f   : > { %v631_v15 = vperm.slane %v630_v14, 0 }
 0x431   : > { %980 = vrcp.f32 %v631_v15  ;;  %v643_v21 = vand.u32 2147483648, %v631_v15  ;;  %v641_v23 = vand.u32 2147483647, %v631_v15  ;;  %vm637_vm14 = vweird.f32 %v631_v15 }
 0x433   : > { %v644_v26 = vor.u32 1.1754944e-38, %v643_v21  ;;  %vm642_vm0 = vcmp.eq.f32.partialorder %v641_v23, 8.507059e+37 }
 0x437   : > { %v981_v17 = vpop.eup %980 }
 0x438   : > { %v633_v18 = vmul.f32 %v981_v17, %v631_v15  ;;  %vm638_vm13 = vweird.f32 %v981_v17  ;;  %v808_v15 = vshrl.u32 %v807_v13, 7 }
 0x439   : > { %vm639_vm15 = vmor %vm637_vm14, %vm638_vm13 }
 0x43a   : > { %v634_v20 = vsub.f32 1.0, %v633_v18  ;;  %vm809_vm3 = vcmp.lt.s32.totalorder %v808_v15, 4 }
 0x43c   : > { %v635_v22 = vmul.f32 %v981_v17, %v634_v20 }
 0x43e   : > { %v636_v25 = vadd.f32 %v981_v17, %v635_v22 }
 0x440   : > { %v640_v27 = vsel %vm639_vm15, %v981_v17, %v636_v25 }
 0x441   : > { %v645_v28 = vsel %vm642_vm0, %v644_v26, %v640_v27 }
 0x442   : > { %v646_v30 = vmul.f32 %v645_v28, %v624_v11 }
 0x444   : > { %743 = vmatpush.msrb.mxu0 %v646_v30  ;;  %921 = vmatpush.msra.mxu3 %v646_v30 }
 0x445   : > { %909 = vmatmul.msk.f32.vlgmr.msra.gmra.mxu3 %vm703_vm1, %v650_v31  ;;  %906 = vmatmul.msk.f32.vlgmr.msrb.gmra.mxu0 %vm703_vm1, %v647_v32 }
 0x44d   : > { %910 = vmatmul.msk.f32.gmra.mxu3 %vm703_vm1, %v651_v34  ;;  %907 = vmatmul.msk.f32.gmra.mxu0 %vm703_vm1, %v648_v35 }
 0x455   : > { %911 = vmatmul.msk.f32.gmra.mxu3 %vm703_vm1, %v652_v37  ;;  %908 = vmatmul.msk.f32.gmra.mxu0 %vm703_vm1, %v649_v38 }
 0x45d   : > { %912 = vmatmul.msk.f32.gmra.mxu3 %vm703_vm1, %v653_v39 }
 0x465   : > { %913 = vmatmul.msk.f32.gmra.mxu3 %vm703_vm1, %v654_v40 }
 0x4c2   : > { %v745_v46 = vpop.f32.mrf.mxu0 }
 0x4c3   : > { %v746_v3 = vadd.f32 %v745_v46, %v666_v63 }
 0x4c8   : > { %v754_v41 = vpop.f32.mrf.mxu3 }
 0x4c9   : > { %v755_v59 = vadd.f32 %v754_v41, %v681_v51 }
 0x4ca   : > { %v748_v50 = vpop.f32.mrf.mxu0 }
 0x4cb   : > { %v749_v1 = vadd.f32 %v748_v50, %v671_v62 }
 0x4d0   : > { %v757_v43 = vpop.f32.mrf.mxu3 }
 0x4d1   : > { %v758_v57 = vadd.f32 %v757_v43, %v686_v47 }
 0x4d2   : > { %v751_v58 = vpop.f32.mrf.mxu0 }
 0x4d3   : > { %v752_v61 = vadd.f32 %v751_v58, %v676_v52 }
 0x4d8   : > { %v760_v45 = vpop.f32.mrf.mxu3 }
 0x4d9   : > { %v761_v56 = vadd.f32 %v760_v45, %v691_v48 }
 0x4e0   : > { %v763_v49 = vpop.f32.mrf.mxu3 }
 0x4e1   : > { %v764_v54 = vadd.f32 %v763_v49, %v696_v44 }
 0x4e8   : > { %v766_v53 = vpop.f32.mrf.mxu3 }
 0x4e9   : > { %v767_v55 = vadd.f32 %v766_v53, %v701_v42 }
 0x4eb   : > { %982 = vtanh.f32 %v767_v55 }
 0x4ec   : > { %984 = vtanh.f32 %v764_v54 }
 0x4ed   : > { %986 = vtanh.f32 %v761_v56 }
 0x4ee   : > { %988 = vtanh.f32 %v758_v57 }
 0x4ef   : > { %990 = vtanh.f32 %v755_v59 }
 0x4f0   : > { %992 = vtanh.f32 %v752_v61 }
 0x4f1   : > { %v983_v60 = vpop.eup %982  ;;  %994 = vtanh.f32 %v749_v1 }
 0x4f2   : > { %795 = vmatpush.msra.mxu2 %v983_v60  ;;  %v985_v0 = vpop.eup %984  ;;  %996 = vtanh.f32 %v746_v3 }
 0x4f3   : > { %v987_v2 = vpop.eup %986 }
 0x4f4   : > { %796 = vmatpush.msra.mxu2 %v985_v0  ;;  %v989_v4 = vpop.eup %988 }
 0x4f5   : > { %v991_v5 = vpop.eup %990 }
 0x4f6   : > { %797 = vmatpush.msra.mxu2 %v987_v2  ;;  %v993_v6 = vpop.eup %992 }
 0x4f7   : > { %v995_v7 = vpop.eup %994 }
 0x4f8   : > { %798 = vmatpush.msra.mxu2 %v989_v4  ;;  %v997_v9 = vpop.eup %996 }
 0x4fa   : > { %799 = vmatpush.msra.mxu2 %v991_v5 }
 0x4fc   : > { %800 = vmatpush.msra.mxu2 %v993_v6 }
 0x4fe   : > { %801 = vmatpush.msra.mxu2 %v995_v7 }
 0x500   : > { %802 = vmatpush.msra.mxu2 %v997_v9 }
 0x501   : > { %914 = vmatmul.msk.f32.vlgmr.msra.gmra.mxu2 %vm440_vm2, %v777_v8 }
 0x584   : > { %v804_v11 = vpop.f32.mrf.mxu2 }
 0x585   : > { %v805_v12 = vadd.f32 %v804_v11, %v782_v10 }
 0x587   : > { %v810_v14 = vmul.f32 1.442695, %v805_v12 }
 0x589   : > { %998 = vpow2.f32 %v810_v14 }
 0x58f   : > { %v999_v16 = vpop.eup %998 }
 0x590   : > { %v812_v17 = vsel %vm809_vm3, %v805_v12, %v999_v16 }
 0x591   : > { %813 = vst.msk [vmem:[%s379_s16] sm:$0xff] %vm703_vm1, %v812_v17 }
 0x592   : > { %1027 = shalt.err (!%p1024_p3)
}
 0x593   : > { %922 = dma.vmem_to_hbm [thread:$0]  (%p1164_p5), %s828_s22, 128, %s830_s24, %s815_s25  }
 0x594 PF: > { %p928_p4 = scmp.ge.s32.totalorder %s1062_s20, 2  ;;  %s841_s29 = sand.u32 1, %s1050_s17  }
 0x595   : > { %s842_s16 = scalar_lea.sflag [#allocation3], %s841_s29 }
 0x596   : > { %p925_p7 = pnand %p928_p4, %p1168_p6 }
 0x598   : > { %p926_p8 = pneg %p925_p7 }
 0x59a   : > { %1045 = dma.done.wait (%p926_p8), %s842_s16, 128  }
 0x59b   : > { %1047 = vsyncadd (%p926_p8), %s842_s16, 4294967168  ;;  %p21_p9 = scmp.ge.s32.totalorder %s1151_s23, 4   ;;  %s1348_s17 = smov %s1054_s18 }
 0x59c   : > { %s1349_s18 = smov %s1058_s19  ;;  %s1350_s19 = smov %s1162_s26 }
 0x59d   : > { %s1351_s20 = smov %s1151_s23  ;;  %23 = sbr.rel (!%p21_p9) target bundleno = 5 (0x5), region = 99 }
 0x5a2   :  { %848 = vsyncpa [#allocation3], 1 }
 0x5a3   :  { %850 = vsyncpa [#allocation3 + $0x1], 1 }

</bundles_post_ra>
